<compile_context>
chip_gen: v7x
topology: tpu7x:2x2x1
jax: 0.10.0
libtpu: 0.0.40
codegen_flags: <defaults>
</compile_context>

<pallas_src>
import jax
import jax.numpy as jnp
from jax.experimental import pallas as pl
from jax.experimental.pallas import tpu as pltpu


def mlp_kernel(x_ref, w1_ref, b1_ref, w2_ref, b2_ref, w3_ref, b3_ref, o_ref):
    cdt = w1_ref.dtype  # compute dtype fed to the MXU (f32 or bf16)

    # Cast-on-load (no-op when cdt == x dtype); avoids a wrapper-side HBM pass.
    x = x_ref[...].astype(cdt)

    # Layer 1: Linear + ReLU   (Dropout(0.3) is identity at inference)
    h1 = jnp.dot(x, w1_ref[...], preferred_element_type=jnp.float32)
    h1 = jnp.maximum(h1 + b1_ref[...], 0.0)          # f32 bias/ReLU on the VPU

    # Layer 2: Linear + ReLU   (Dropout(0.2) is identity at inference)
    h2 = jnp.dot(h1.astype(cdt), w2_ref[...], preferred_element_type=jnp.float32)
    h2 = jnp.maximum(h2 + b2_ref[...], 0.0)

    # Layer 3: Linear (logits); unpadded, full-array-width store.
    out = jnp.dot(h2.astype(cdt), w3_ref[...], preferred_element_type=jnp.float32)
    o_ref[...] = (out + b3_ref[...]).astype(o_ref.dtype)


def _round_up(n, m):
    return ((n + m - 1) // m) * m


def custom_nn_forward(x, w1, b1, w2, b2, w3, b3, *,
                      block_batch=1024, compute_dtype=jnp.float32):
    """Fused MLP forward. Weights are (in_features, out_features); biases (1, out)."""
    batch, input_size = x.shape
    hidden1 = w1.shape[1]
    hidden2 = w2.shape[1]
    num_classes = w3.shape[1]

    # ---- Batch tile. bf16 packs 2 rows/sublane -> 16-row granularity; f32 -> 8.
    g = 16 if compute_dtype == jnp.bfloat16 else 8
    tb = min(_round_up(block_batch, g), _round_up(batch, g))
    num_blocks = pl.cdiv(batch, tb)
    # v7x megacore: if the batch is big enough that two tiles still amortize the
    # ~0.35us/step overhead, keep >=2 tiles so both TensorCores get work.
    if num_blocks == 1 and batch >= 1024:
        tb = _round_up(pl.cdiv(batch, 2), g)
        num_blocks = pl.cdiv(batch, tb)

    # ---- Weights/biases are tiny: cast once in the wrapper (negligible bytes).
    #      x is NOT cast here; the kernel casts on load (no extra HBM pass).
    w1 = w1.astype(compute_dtype)
    w2 = w2.astype(compute_dtype)
    w3 = w3.astype(compute_dtype)
    b1 = b1.astype(jnp.float32)
    b2 = b2.astype(jnp.float32)
    b3 = b3.astype(jnp.float32)

    flops = 2 * batch * (input_size * hidden1 + hidden1 * hidden2 + hidden2 * num_classes)
    weight_bytes = sum(int(a.size) * a.dtype.itemsize for a in (w1, b1, w2, b2, w3, b3))
    bytes_accessed = (
        int(x.size) * x.dtype.itemsize + weight_bytes + batch * num_classes * 4
    )

    # ---- VMEM budget: 2x (double-buffered) x/out tiles + resident weights.
    #      Only set an explicit limit when the default scoped VMEM is too small;
    #      cap under v7x's 64 MiB physical VMEM.
    tile_bytes = tb * input_size * x.dtype.itemsize + tb * num_classes * 4
    vmem_needed = 2 * tile_bytes + weight_bytes
    vmem_limit = None
    if vmem_needed > 12 * 1024 * 1024:
        vmem_limit = min(int(vmem_needed * 1.5) + (1 << 20), 56 * 1024 * 1024)

    # Tiny reused operands: whole-array, VMEM-resident, not pipelined per tile.
    vmem_resident = lambda: pl.BlockSpec(memory_space=pltpu.MemorySpace.VMEM)

    out = pl.pallas_call(
        mlp_kernel,
        out_shape=jax.ShapeDtypeStruct((batch, num_classes), jnp.float32),
        grid=(num_blocks,),
        in_specs=[
            pl.BlockSpec((tb, input_size), lambda i: (i, 0)),  # x: batch-tiled
            vmem_resident(), vmem_resident(),                  # w1, b1
            vmem_resident(), vmem_resident(),                  # w2, b2
            vmem_resident(), vmem_resident(),                  # w3, b3
        ],
        out_specs=pl.BlockSpec((tb, num_classes), lambda i: (i, 0)),
        compiler_params=pltpu.CompilerParams(
            dimension_semantics=("parallel",),                 # megacore split on v7x
            vmem_limit_bytes=vmem_limit,
        ),
        cost_estimate=pl.CostEstimate(
            flops=flops, transcendentals=0, bytes_accessed=bytes_accessed
        ),
    )(x, w1, b1, w2, b2, w3, b3)

    return out


def xavier_uniform(key, fan_in, fan_out):
    # Matches torch.nn.init.xavier_uniform_ distribution (deterministic via PRNGKey).
    limit = (6.0 / (fan_in + fan_out)) ** 0.5
    return jax.random.uniform(key, (fan_in, fan_out), jnp.float32, -limit, limit)


def _reference(x, w1, b1, w2, b2, w3, b3, compute_dtype):
    # Pure-JAX reference with the identical cast/accumulation recipe.
    cdt = compute_dtype
    h = jnp.maximum(
        jnp.dot(x.astype(cdt), w1.astype(cdt), preferred_element_type=jnp.float32) + b1, 0.0)
    h = jnp.maximum(
        jnp.dot(h.astype(cdt), w2.astype(cdt), preferred_element_type=jnp.float32) + b2, 0.0)
    return jnp.dot(h.astype(cdt), w3.astype(cdt), preferred_element_type=jnp.float32) + b3


if __name__ == "__main__":
    # Shapes implied by the module: input_size=32, hidden_size=32 (-> hidden//2=16),
    # num_classes=8. batch=64 -> a single 64-row tile (review: one tile for toy batch).
    batch, input_size, hidden_size, num_classes = 64, 32, 32, 8

    key = jax.random.PRNGKey(0)
    kx, k1, k2, k3 = jax.random.split(key, 4)

    x = jax.random.normal(kx, (batch, input_size), jnp.float32)

    w1 = xavier_uniform(k1, input_size, hidden_size)
    b1 = jnp.zeros((1, hidden_size), jnp.float32)
    w2 = xavier_uniform(k2, hidden_size, hidden_size // 2)
    b2 = jnp.zeros((1, hidden_size // 2), jnp.float32)
    w3 = xavier_uniform(k3, hidden_size // 2, num_classes)
    b3 = jnp.zeros((1, num_classes), jnp.float32)

    # ---- Primary run: f32 everywhere (matches PyTorch f32 numerics tightly). ----
    out = custom_nn_forward(x, w1, b1, w2, b2, w3, b3)
    jax.block_until_ready(out)
    ref = _reference(x, w1, b1, w2, b2, w3, b3, jnp.float32)
    assert out.shape == (batch, num_classes), f"bad output shape {out.shape}"
    assert jnp.allclose(out, ref, atol=1e-5, rtol=1e-5), "f32 mismatch vs reference"

    # ---- Secondary check: bf16 MXU inputs + tiled/ragged batch (50 rows, tb=16). ----
    x2 = jax.random.normal(jax.random.PRNGKey(1), (50, input_size), jnp.float32)
    out2 = custom_nn_forward(
        x2, w1, b1, w2, b2, w3, b3, block_batch=16, compute_dtype=jnp.bfloat16
    )
    jax.block_until_ready(out2)
    ref2 = _reference(x2, w1, b1, w2, b2, w3, b3, jnp.bfloat16)
    assert out2.shape == (50, num_classes), f"bad output shape {out2.shape}"
    assert jnp.allclose(out2, ref2, atol=2e-2, rtol=2e-2), "bf16 mismatch vs reference"

    print("KERNEL_OK")
</pallas_src>

<mosaic_0001>
module attributes {stable_mosaic.version = 11 : i64} {
  func.func @mlp_kernel(%arg0: i32, %arg1: memref<64x32xf32, #tpu.memory_space<vmem>>, %arg2: memref<32x32xf32, #tpu.memory_space<vmem>>, %arg3: memref<1x32xf32, #tpu.memory_space<vmem>>, %arg4: memref<32x16xf32, #tpu.memory_space<vmem>>, %arg5: memref<1x16xf32, #tpu.memory_space<vmem>>, %arg6: memref<16x8xf32, #tpu.memory_space<vmem>>, %arg7: memref<1x8xf32, #tpu.memory_space<vmem>>, %arg8: memref<64x8xf32, #tpu.memory_space<vmem>>) attributes {dimension_semantics = [#tpu.dimension_semantics<parallel>], iteration_bounds = array<i64: 1>, scalar_prefetch = 0 : i64, scratch_operands = 0 : i64, tpu.core_type = #tpu.core_type<tc>, window_params = [{transform_indices = @transform_0, window_bounds = array<i64: 64, 32>}, {pipeline_mode = #tpu.pipeline_mode<synchronous>, transform_indices = @transform_1, window_bounds = array<i64: 32, 32>}, {pipeline_mode = #tpu.pipeline_mode<synchronous>, transform_indices = @transform_2, window_bounds = array<i64: 1, 32>}, {pipeline_mode = #tpu.pipeline_mode<synchronous>, transform_indices = @transform_3, window_bounds = array<i64: 32, 16>}, {pipeline_mode = #tpu.pipeline_mode<synchronous>, transform_indices = @transform_4, window_bounds = array<i64: 1, 16>}, {pipeline_mode = #tpu.pipeline_mode<synchronous>, transform_indices = @transform_5, window_bounds = array<i64: 16, 8>}, {pipeline_mode = #tpu.pipeline_mode<synchronous>, transform_indices = @transform_6, window_bounds = array<i64: 1, 8>}, {transform_indices = @transform_7, window_bounds = array<i64: 64, 8>}]} {
    %c0 = arith.constant 0 : index
    %c0_0 = arith.constant 0 : index
    %0 = vector.load %arg1[%c0, %c0_0] : memref<64x32xf32, #tpu.memory_space<vmem>>, vector<64x32xf32>
    %c0_1 = arith.constant 0 : index
    %c0_2 = arith.constant 0 : index
    %1 = vector.load %arg2[%c0_1, %c0_2] : memref<32x32xf32, #tpu.memory_space<vmem>>, vector<32x32xf32>
    %cst = arith.constant dense<0.000000e+00> : vector<64x32xf32>
    %2 = tpu.matmul %0, %1, %cst {dimension_numbers = #tpu.dot_dimension_numbers<[1], [0], [0], [1], [0, 0, 1, 1], [], []>} : vector<64x32xf32>, vector<32x32xf32>, vector<64x32xf32> -> vector<64x32xf32>
    %c0_3 = arith.constant 0 : index
    %c0_4 = arith.constant 0 : index
    %3 = vector.load %arg3[%c0_3, %c0_4] : memref<1x32xf32, #tpu.memory_space<vmem>>, vector<1x32xf32>
    %4 = vector.broadcast %3 : vector<1x32xf32> to vector<64x32xf32>
    %5 = arith.addf %2, %4 : vector<64x32xf32>
    %cst_5 = arith.constant 0.000000e+00 : f32
    %6 = vector.broadcast %cst_5 : f32 to vector<64x32xf32>
    %7 = arith.maximumf %5, %6 : vector<64x32xf32>
    %c0_6 = arith.constant 0 : index
    %c0_7 = arith.constant 0 : index
    %8 = vector.load %arg4[%c0_6, %c0_7] : memref<32x16xf32, #tpu.memory_space<vmem>>, vector<32x16xf32>
    %cst_8 = arith.constant dense<0.000000e+00> : vector<64x16xf32>
    %9 = tpu.matmul %7, %8, %cst_8 {dimension_numbers = #tpu.dot_dimension_numbers<[1], [0], [0], [1], [0, 0, 1, 1], [], []>} : vector<64x32xf32>, vector<32x16xf32>, vector<64x16xf32> -> vector<64x16xf32>
    %c0_9 = arith.constant 0 : index
    %c0_10 = arith.constant 0 : index
    %10 = vector.load %arg5[%c0_9, %c0_10] : memref<1x16xf32, #tpu.memory_space<vmem>>, vector<1x16xf32>
    %11 = vector.broadcast %10 : vector<1x16xf32> to vector<64x16xf32>
    %12 = arith.addf %9, %11 : vector<64x16xf32>
    %cst_11 = arith.constant 0.000000e+00 : f32
    %13 = vector.broadcast %cst_11 : f32 to vector<64x16xf32>
    %14 = arith.maximumf %12, %13 : vector<64x16xf32>
    %c0_12 = arith.constant 0 : index
    %c0_13 = arith.constant 0 : index
    %15 = vector.load %arg6[%c0_12, %c0_13] : memref<16x8xf32, #tpu.memory_space<vmem>>, vector<16x8xf32>
    %cst_14 = arith.constant dense<0.000000e+00> : vector<64x8xf32>
    %16 = tpu.matmul %14, %15, %cst_14 {dimension_numbers = #tpu.dot_dimension_numbers<[1], [0], [0], [1], [0, 0, 1, 1], [], []>} : vector<64x16xf32>, vector<16x8xf32>, vector<64x8xf32> -> vector<64x8xf32>
    %c0_15 = arith.constant 0 : index
    %c0_16 = arith.constant 0 : index
    %17 = vector.load %arg7[%c0_15, %c0_16] : memref<1x8xf32, #tpu.memory_space<vmem>>, vector<1x8xf32>
    %18 = vector.broadcast %17 : vector<1x8xf32> to vector<64x8xf32>
    %19 = arith.addf %16, %18 : vector<64x8xf32>
    %c0_17 = arith.constant 0 : index
    %c0_18 = arith.constant 0 : index
    %20 = vector.load %arg8[%c0_17, %c0_18] : memref<64x8xf32, #tpu.memory_space<vmem>>, vector<64x8xf32>
    tpu.vector_store %arg8[%c0_17, %c0_18], %19 {strides = array<i32>} : memref<64x8xf32, #tpu.memory_space<vmem>>, vector<64x8xf32>,
    return
  }
  func.func @transform_0(%arg0: i32) -> (i32, i32) {
    %c0_i32 = arith.constant 0 : i32
    %c0_i32_0 = arith.constant 0 : i32
    return %arg0, %c0_i32 : i32, i32
  }
  func.func @transform_1(%arg0: i32) -> (i32, i32) {
    %c0_i32 = arith.constant 0 : i32
    %c0_i32_0 = arith.constant 0 : i32
    %c0_i32_1 = arith.constant 0 : i32
    return %c0_i32, %c0_i32_0 : i32, i32
  }
  func.func @transform_2(%arg0: i32) -> (i32, i32) {
    %c0_i32 = arith.constant 0 : i32
    %c0_i32_0 = arith.constant 0 : i32
    %c0_i32_1 = arith.constant 0 : i32
    return %c0_i32, %c0_i32_0 : i32, i32
  }
  func.func @transform_3(%arg0: i32) -> (i32, i32) {
    %c0_i32 = arith.constant 0 : i32
    %c0_i32_0 = arith.constant 0 : i32
    %c0_i32_1 = arith.constant 0 : i32
    return %c0_i32, %c0_i32_0 : i32, i32
  }
  func.func @transform_4(%arg0: i32) -> (i32, i32) {
    %c0_i32 = arith.constant 0 : i32
    %c0_i32_0 = arith.constant 0 : i32
    %c0_i32_1 = arith.constant 0 : i32
    return %c0_i32, %c0_i32_0 : i32, i32
  }
  func.func @transform_5(%arg0: i32) -> (i32, i32) {
    %c0_i32 = arith.constant 0 : i32
    %c0_i32_0 = arith.constant 0 : i32
    %c0_i32_1 = arith.constant 0 : i32
    return %c0_i32, %c0_i32_0 : i32, i32
  }
  func.func @transform_6(%arg0: i32) -> (i32, i32) {
    %c0_i32 = arith.constant 0 : i32
    %c0_i32_0 = arith.constant 0 : i32
    %c0_i32_1 = arith.constant 0 : i32
    return %c0_i32, %c0_i32_0 : i32, i32
  }
  func.func @transform_7(%arg0: i32) -> (i32, i32) {
    %c0_i32 = arith.constant 0 : i32
    %c0_i32_0 = arith.constant 0 : i32
    return %arg0, %c0_i32 : i32, i32
  }
}

</mosaic_0001>

<bundles_post_ra>
// kernel: tpu_custom_call.1
= control target key start
LH: loop header
LB: loop body
LE: loop exit
PB: predicated region body
PF: predicated region fallthrough
CT: control target
= control target key end

     0   :  { %vm45_vm0 = vcmask 261120   ;;  %vm340_vm1 = vcmask 130048   ;;  %vm470_vm2 = vcmask 64512   ;;  %s783_s1 = inlined_call_operand.vmem [shape: f32[32,32], index: 1, kind: input, shape index: {}]   ;;  %s784_s0 = inlined_call_operand.vmem [shape: f32[64,32], index: 0, kind: input, shape index: {}]   ;;  %s785_s3 = inlined_call_operand.vmem [shape: f32[32,16], index: 3, kind: input, shape index: {}]   ;;  %s786_s5 = inlined_call_operand.vmem [shape: f32[16,8], index: 5, kind: input, shape index: {}]   ;;  %s787_s2 = inlined_call_operand.vmem [shape: f32[1,32], index: 2, kind: input, shape index: {}]   ;;  %s788_s4 = inlined_call_operand.vmem [shape: f32[1,16], index: 4, kind: input, shape index: {}]   ;;  %s789_s6 = inlined_call_operand.vmem [shape: f32[1,8], index: 6, kind: input, shape index: {}]   ;;  %s790_s7 = inlined_call_operand.vmem [shape: f32[64,8], index: 7, kind: output, shape index: {}]  }
   0x1   :  { %v34_v0 = vld [vmem:[%s783_s1] sm:$0xff]  ;;  %v35_v1 = vld [vmem:[%s783_s1 + $0x8] sm:$0xff]  ;;  %v36_v2 = vld [vmem:[%s783_s1 + $0x10] sm:$0xff] }
   0x2   :  { %v600_v3 = vpack.c.bf16 %v35_v1, %v34_v0  ;;  %v37_v4 = vld [vmem:[%s783_s1 + $0x18] sm:$0xff]  ;;  %v26_v5 = vld [vmem:[%s784_s0] sm:$0xff]  ;;  %v184_v9 = vld [vmem:[%s785_s3 + $0x8] sm:$0xff] }
   0x3   :  { %v604_v6 = vpack.c.bf16 %v37_v4, %v36_v2  ;;  %552 = vmatprep.mubr.msk.f32.mxu0 %vm45_vm0, %v26_v5  ;;  %v30_v7 = vld [vmem:[%s784_s0 + $0x20] sm:$0xff]  ;;  %v27_v11 = vld [vmem:[%s784_s0 + $0x8] sm:$0xff]  ;;  %v28_v13 = vld [vmem:[%s784_s0 + $0x10] sm:$0xff] }
   0x4   :  { %601 = vmatprep.subr.bf16.mxu0 %v600_v3  ;;  %620 = vmatprep.subr.bf16.mxu1 %v600_v3  ;;  %v183_v8 = vld [vmem:[%s785_s3] sm:$0xff]  ;;  %v31_v12 = vld [vmem:[%s784_s0 + $0x28] sm:$0xff]  ;;  %v32_v14 = vld [vmem:[%s784_s0 + $0x30] sm:$0xff] }
   0x5   :  { %603 = vmatpush3.bf16.msra.mxu0 %v600_v3  ;;  %622 = vmatpush3.bf16.msra.mxu1 %v600_v3  ;;  %v608_v10 = vpack.c.bf16 %v184_v9, %v183_v8  ;;  %v29_v15 = vld [vmem:[%s784_s0 + $0x18] sm:$0xff]  ;;  %v185_v17 = vld [vmem:[%s785_s3 + $0x10] sm:$0xff]  ;;  %v331_v20 = vld [vmem:[%s786_s5] sm:$0xff] }
   0x6   :  { %605 = vmatprep.subr.bf16.mxu0 %v604_v6  ;;  %621 = vmatprep.subr.bf16.mxu1 %v604_v6  ;;  %v33_v16 = vld [vmem:[%s784_s0 + $0x38] sm:$0xff]  ;;  %v332_v21 = vld [vmem:[%s786_s5 + $0x8] sm:$0xff]  ;;  %v483_v23 = vld [vmem:[%s787_s2] ss:$0 sm:$0xff] }
   0x7   :  { %558 = vmatprep.mubr.msk.f32.mxu1 %vm45_vm0, %v30_v7  ;;  %v186_v18 = vld [vmem:[%s785_s3 + $0x18] sm:$0xff]  ;;  %v616_v22 = vpack.c.bf16 %v332_v21, %v331_v20  ;;  %v492_v48 = vld [vmem:[%s788_s4] ss:$0 sm:$0xff] }
   0x8   :  { %v612_v19 = vpack.c.bf16 %v186_v18, %v185_v17  ;;  %v501_v9 = vld [vmem:[%s789_s6] ss:$0 sm:$0xff] }
   0x9   :  { %607 = vmatpush3.bf16.msra.mxu0 %v604_v6  ;;  %623 = vmatpush3.bf16.msra.mxu1 %v604_v6 }
   0xa   :  { %609 = vmatprep.subr.bf16.mxu1 %v608_v10  ;;  %617 = vmatprep.subr.bf16.mxu0 %v616_v22 }
   0xc   :  { %553 = vmatmul.mubr.msk.f32.vlgmr.msra.gmra.mrb[0].mxu0 %vm45_vm0, %v27_v11  ;;  %559 = vmatmul.mubr.msk.f32.vlgmr.msra.gmra.mrb[0].mxu1 %vm45_vm0, %v31_v12 }
   0xd   :  { %555 = vmatprep.mubr.msk.f32.mxu0 %vm45_vm0, %v28_v13  ;;  %561 = vmatprep.mubr.msk.f32.mxu1 %vm45_vm0, %v32_v14 }
   0xe   :  { %611 = vmatpush3.bf16.msra.mxu1 %v608_v10  ;;  %619 = vmatpush3.bf16.msra.mxu0 %v616_v22 }
   0xf   :  { %613 = vmatprep.subr.bf16.mxu1 %v612_v19 }
  0x10   :  { %556 = vmatmul.mubr.msk.f32.gmra.mrb[2].mxu0 %vm45_vm0, %v29_v15  ;;  %562 = vmatmul.mubr.msk.f32.gmra.mrb[2].mxu1 %vm45_vm0, %v33_v16 }
  0x12   :  { %615 = vmatpush3.bf16.msra.mxu1 %v612_v19 }
  0xdf   :  { %v554_v24 = vpop.f32.mrb[0].mxu0  ;;  %v560_v25 = vpop.f32.mrb[0].mxu1 }
  0xe0   :  { %v142_v26 = vadd.f32 %v554_v24, %v483_v23  ;;  %v136_v27 = vpop.f32.mrb[1].mxu0  ;;  %v156_v28 = vpop.f32.mrb[1].mxu1  ;;  %v162_v43 = vadd.f32 %v560_v25, %v483_v23 }
  0xe1   :  { %v137_v29 = vadd.f32 %v483_v23, %v136_v27  ;;  %v157_v32 = vadd.f32 %v483_v23, %v156_v28 }
  0xe2   :  { %v176_v34 = vmax.f32 %v142_v26, 0.0  ;;  %v180_v45 = vmax.f32 %v162_v43, 0.0 }
  0xe3   :  { %v175_v30 = vmax.f32 %v137_v29, 0.0  ;;  %v557_v31 = vpop.f32.mrb[2].mxu0  ;;  %v563_v33 = vpop.f32.mrb[2].mxu1  ;;  %v179_v40 = vmax.f32 %v157_v32, 0.0 }
  0xe4   :  { %v152_v35 = vadd.f32 %v557_v31, %v483_v23  ;;  %v146_v36 = vpop.f32.mrb[3].mxu0  ;;  %v166_v37 = vpop.f32.mrb[3].mxu1  ;;  %v172_v46 = vadd.f32 %v563_v33, %v483_v23 }
  0xe5   :  { %v147_v38 = vadd.f32 %v483_v23, %v146_v36  ;;  %572 = vmatprep.mubr.msk.f32.mxu1 %vm45_vm0, %v175_v30  ;;  %v167_v41 = vadd.f32 %v483_v23, %v166_v37 }
  0xe6   :  { %573 = vmatmul.mubr.msk.f32.vlgmr.msra.gmra.mrb[4].mxu1 %vm45_vm0, %v176_v34  ;;  %v178_v42 = vmax.f32 %v152_v35, 0.0  ;;  %v182_v47 = vmax.f32 %v172_v46, 0.0 }
  0xe7   :  { %v177_v39 = vmax.f32 %v147_v38, 0.0  ;;  %v181_v44 = vmax.f32 %v167_v41, 0.0 }
  0xe9   :  { %575 = vmatprep.mubr.msk.f32.mxu1 %vm45_vm0, %v177_v39 }
  0xea   :  { %576 = vmatmul.mubr.msk.f32.gmra.mrb[6].mxu1 %vm45_vm0, %v178_v42 }
  0xeb   :  { %578 = vmatprep.mubr.msk.f32.mxu1 %vm45_vm0, %v179_v40 }
  0xee   :  { %579 = vmatmul.mubr.msk.f32.gmra.mrb[8].mxu1 %vm45_vm0, %v180_v45 }
  0xef   :  { %581 = vmatprep.mubr.msk.f32.mxu1 %vm45_vm0, %v181_v44 }
  0xf2   :  { %582 = vmatmul.mubr.msk.f32.gmra.mrb[10].mxu1 %vm45_vm0, %v182_v47 }
 0x1b9   :  { %v574_v49 = vpop.f32.mrb[4].mxu1 }
 0x1ba   :  { %v290_v50 = vadd.f32 %v574_v49, %v492_v48  ;;  %v284_v51 = vpop.f32.mrb[5].mxu1 }
 0x1bb   :  { %v285_v52 = vadd.f32 %v492_v48, %v284_v51 }
 0x1bc   :  { %v324_v55 = vmax.f32 %v290_v50, 0.0 }
 0x1bd   :  { %v323_v53 = vmax.f32 %v285_v52, 0.0  ;;  %v577_v54 = vpop.f32.mrb[6].mxu1 }
 0x1be   :  { %v300_v56 = vadd.f32 %v577_v54, %v492_v48  ;;  %v294_v57 = vpop.f32.mrb[7].mxu1 }
 0x1bf   :  { %v295_v58 = vadd.f32 %v492_v48, %v294_v57  ;;  %588 = vmatprep.mubr.msk.f32.mxu0 %vm340_vm1, %v323_v53 }
 0x1c0   :  { %589 = vmatmul.mubr.msk.f32.vlgmr.msra.gmra.mrb[4].mxu0 %vm340_vm1, %v324_v55  ;;  %v326_v61 = vmax.f32 %v300_v56, 0.0 }
 0x1c1   :  { %v325_v59 = vmax.f32 %v295_v58, 0.0  ;;  %v580_v60 = vpop.f32.mrb[8].mxu1 }
 0x1c2   :  { %v310_v62 = vadd.f32 %v580_v60, %v492_v48  ;;  %v304_v63 = vpop.f32.mrb[9].mxu1 }
 0x1c3   :  { %v305_v0 = vadd.f32 %v492_v48, %v304_v63  ;;  %591 = vmatprep.mubr.msk.f32.mxu0 %vm340_vm1, %v325_v59 }
 0x1c4   :  { %592 = vmatmul.mubr.msk.f32.gmra.mrb[6].mxu0 %vm340_vm1, %v326_v61  ;;  %v328_v3 = vmax.f32 %v310_v62, 0.0 }
 0x1c5   :  { %v327_v1 = vmax.f32 %v305_v0, 0.0  ;;  %v583_v2 = vpop.f32.mrb[10].mxu1 }
 0x1c6   :  { %v320_v4 = vadd.f32 %v583_v2, %v492_v48  ;;  %v314_v5 = vpop.f32.mrb[11].mxu1 }
 0x1c7   :  { %v315_v6 = vadd.f32 %v492_v48, %v314_v5  ;;  %594 = vmatprep.mubr.msk.f32.mxu0 %vm340_vm1, %v327_v1 }
 0x1c8   :  { %595 = vmatmul.mubr.msk.f32.gmra.mrb[8].mxu0 %vm340_vm1, %v328_v3  ;;  %v330_v8 = vmax.f32 %v320_v4, 0.0 }
 0x1c9   :  { %v329_v7 = vmax.f32 %v315_v6, 0.0 }
 0x1cb   :  { %597 = vmatprep.mubr.msk.f32.mxu0 %vm340_vm1, %v329_v7 }
 0x1cc   :  { %598 = vmatmul.mubr.msk.f32.gmra.mrb[10].mxu0 %vm340_vm1, %v330_v8 }
 0x293   :  { %v590_v10 = vpop.f32.mrb[4].mxu0 }
 0x294   :  { %v437_v11 = vadd.f32 %v590_v10, %v501_v9  ;;  %v431_v12 = vpop.f32.mrb[5].mxu0 }
 0x295   :  { %v432_v13 = vadd.f32 %v501_v9, %v431_v12 }
 0x296   :  { %472 = vst.msk [vmem:[%s790_s7 + $0x8] sm:$0xff] %vm470_vm2, %v437_v11 }
 0x297   :  { %471 = vst.msk [vmem:[%s790_s7] sm:$0xff] %vm470_vm2, %v432_v13  ;;  %v593_v14 = vpop.f32.mrb[6].mxu0 }
 0x298   :  { %v447_v15 = vadd.f32 %v593_v14, %v501_v9  ;;  %v441_v16 = vpop.f32.mrb[7].mxu0 }
 0x299   :  { %v442_v17 = vadd.f32 %v501_v9, %v441_v16 }
 0x29a   :  { %474 = vst.msk [vmem:[%s790_s7 + $0x18] sm:$0xff] %vm470_vm2, %v447_v15 }
 0x29b   :  { %473 = vst.msk [vmem:[%s790_s7 + $0x10] sm:$0xff] %vm470_vm2, %v442_v17  ;;  %v596_v18 = vpop.f32.mrb[8].mxu0 }
 0x29c   :  { %v457_v19 = vadd.f32 %v596_v18, %v501_v9  ;;  %v451_v20 = vpop.f32.mrb[9].mxu0 }
 0x29d   :  { %v452_v21 = vadd.f32 %v501_v9, %v451_v20 }
 0x29e   :  { %476 = vst.msk [vmem:[%s790_s7 + $0x28] sm:$0xff] %vm470_vm2, %v457_v19 }
 0x29f   :  { %475 = vst.msk [vmem:[%s790_s7 + $0x20] sm:$0xff] %vm470_vm2, %v452_v21  ;;  %v599_v22 = vpop.f32.mrb[10].mxu0 }
 0x2a0   :  { %v467_v23 = vadd.f32 %v599_v22, %v501_v9  ;;  %v461_v24 = vpop.f32.mrb[11].mxu0 }
 0x2a1   :  { %v462_v25 = vadd.f32 %v501_v9, %v461_v24 }
 0x2a2   :  { %478 = vst.msk [vmem:[%s790_s7 + $0x38] sm:$0xff] %vm470_vm2, %v467_v23 }
 0x2a3   :  { %477 = vst.msk [vmem:[%s790_s7 + $0x30] sm:$0xff] %vm470_vm2, %v462_v25 }

</bundles_post_ra>
